<compile_context>
chip_gen: v7x
topology: tpu7x:2x2x1
jax: 0.10.0
libtpu: 0.0.40
codegen_flags: <defaults>
</compile_context>

<pallas_src>
import functools

import jax
import jax.numpy as jnp
from jax import lax
from jax.experimental import pallas as pl
from jax.experimental.pallas import tpu as pltpu

EPS = 1e-5


def _ln_kernel_bias(x_ref, w_ref, b_ref, o_ref, *, true_h):
    # x_ref: (tile_rows, hidden_p); w_ref/b_ref: (1, hidden_p)
    x = x_ref[...].astype(jnp.float32)
    inv_h = jnp.float32(1.0 / true_h)
    s1 = jnp.sum(x, axis=-1, keepdims=True)
    s2 = jnp.sum(x * x, axis=-1, keepdims=True)
    mean = s1 * inv_h
    var = jnp.maximum(s2 * inv_h - mean * mean, 0.0)
    inv = lax.rsqrt(var + EPS)
    y = (x - mean) * inv
    y = y * w_ref[...].astype(jnp.float32) + b_ref[...].astype(jnp.float32)
    o_ref[...] = y.astype(o_ref.dtype)


def _ln_kernel_nobias(x_ref, w_ref, o_ref, *, true_h):
    x = x_ref[...].astype(jnp.float32)
    inv_h = jnp.float32(1.0 / true_h)
    s1 = jnp.sum(x, axis=-1, keepdims=True)
    s2 = jnp.sum(x * x, axis=-1, keepdims=True)
    mean = s1 * inv_h
    var = jnp.maximum(s2 * inv_h - mean * mean, 0.0)
    inv = lax.rsqrt(var + EPS)
    y = (x - mean) * inv * w_ref[...].astype(jnp.float32)
    o_ref[...] = y.astype(o_ref.dtype)


def _round_up(x, m):
    return ((x + m - 1) // m) * m


def _vmem_capacity_bytes():
    """Per-core VMEM capacity; conservative v7x fallback (64 MiB) if the query fails."""
    cap = 64 << 20
    try:
        info = pltpu.get_tpu_info()
        got = getattr(info, "vmem_capacity_bytes", None)
        if got:
            cap = int(got)
    except Exception:
        pass
    return cap


def _choose_tile_rows(rows, hidden_p, x_bytes, out_bytes, footprint_budget):
    # Live VMEM bytes per tile row: double-buffered input + output blocks plus
    # ~3 full-tile f32 intermediates (f32 cast of x, centered/normalized temp, y).
    per_row = hidden_p * (2 * x_bytes + 2 * out_bytes + 3 * 4)
    t = footprint_budget // per_row
    t = max(8, (t // 8) * 8)
    # Keep at least ~8 grid steps when rows allow it, so both v7x TensorCores get
    # work and the pipeline stays deep (pure streaming / HBM-bound kernel).
    if rows >= 64:
        t = min(t, _round_up((rows + 7) // 8, 8))
    # Never exceed the (row-padded) problem size.
    t = min(t, _round_up(rows, 8))
    return int(t)


def layer_norm(x, weight, bias=None, *, tile_rows=None):
    """LayerNorm over the last dim of `x` (matches F.layer_norm(x, (C,), w, b, 1e-5))."""
    orig_shape = x.shape
    hidden = orig_shape[-1]
    assert weight.shape == (hidden,)

    rows = 1
    for d in orig_shape[:-1]:
        rows *= d

    # Lane-dense layout: pad the normalized dim up to a multiple of 128 with zeros.
    hidden_p = max(128, _round_up(hidden, 128))

    vmem_cap = _vmem_capacity_bytes()
    # ~24 MiB footprint budget on v7x (64 MiB), ~48 MiB on v5e/v6e (128 MiB).
    footprint_budget = max(8 << 20, (vmem_cap * 3) // 8)
    # Raise the scoped VMEM limit above the small defaults, with physical headroom.
    vmem_limit = int((vmem_cap * 3) // 4)

    x_bytes = jnp.dtype(x.dtype).itemsize
    out_bytes = x_bytes
    if tile_rows is None:
        tile_rows = _choose_tile_rows(rows, hidden_p, x_bytes, out_bytes, footprint_budget)
    tile_rows = max(8, (int(tile_rows) // 8) * 8)

    rows_p = _round_up(rows, tile_rows)

    x2 = x.reshape(rows, hidden)
    if rows_p != rows or hidden_p != hidden:
        x2 = jnp.pad(x2, ((0, rows_p - rows), (0, hidden_p - hidden)))

    w2 = weight if hidden_p == hidden else jnp.pad(weight, (0, hidden_p - hidden))
    w2 = w2.reshape(1, hidden_p)

    grid = (rows_p // tile_rows,)

    x_spec = pl.BlockSpec((tile_rows, hidden_p), lambda i: (i, 0))
    p_spec = pl.BlockSpec((1, hidden_p), lambda i: (0, 0))
    out_spec = pl.BlockSpec((tile_rows, hidden_p), lambda i: (i, 0))

    compiler_params = pltpu.CompilerParams(
        dimension_semantics=("parallel",),
        vmem_limit_bytes=vmem_limit,
    )
    out_shape = jax.ShapeDtypeStruct((rows_p, hidden_p), x.dtype)

    if bias is not None:
        assert bias.shape == (hidden,)
        b2 = bias if hidden_p == hidden else jnp.pad(bias, (0, hidden_p - hidden))
        b2 = b2.reshape(1, hidden_p)
        out2 = pl.pallas_call(
            functools.partial(_ln_kernel_bias, true_h=hidden),
            out_shape=out_shape,
            grid_spec=pltpu.PrefetchScalarGridSpec(
                num_scalar_prefetch=0,
                grid=grid,
                in_specs=[x_spec, p_spec, p_spec],
                out_specs=out_spec,
            ),
            compiler_params=compiler_params,
        )(x2, w2, b2)
    else:
        # Specialized no-bias kernel: no zeros allocation, no extra DMA, no extra add.
        out2 = pl.pallas_call(
            functools.partial(_ln_kernel_nobias, true_h=hidden),
            out_shape=out_shape,
            grid_spec=pltpu.PrefetchScalarGridSpec(
                num_scalar_prefetch=0,
                grid=grid,
                in_specs=[x_spec, p_spec],
                out_specs=out_spec,
            ),
            compiler_params=compiler_params,
        )(x2, w2)

    out2 = out2[:rows, :hidden]
    return out2.reshape(orig_shape)


if __name__ == "__main__":
    key = jax.random.PRNGKey(0)
    B, T, C = 2, 8, 32  # batch, seq, hidden (ndim = C)

    x = jax.random.normal(key, (B, T, C), dtype=jnp.float32)

    # Parameters as in LayerNorm.__init__: weight = ones(ndim), bias = zeros(ndim)
    weight = jnp.ones((C,), dtype=jnp.float32)
    bias = jnp.zeros((C,), dtype=jnp.float32)

    # With-bias path
    y = layer_norm(x, weight, bias)
    y = jax.block_until_ready(y)

    # No-bias path (bias=False in the PyTorch module)
    y_nb = layer_norm(x, weight, None)
    y_nb = jax.block_until_ready(y_nb)

    # Reference check in plain JAX
    mean = jnp.mean(x, axis=-1, keepdims=True)
    var = jnp.mean((x - mean) ** 2, axis=-1, keepdims=True)
    ref = (x - mean) / jnp.sqrt(var + EPS) * weight + bias
    ref_nb = (x - mean) / jnp.sqrt(var + EPS) * weight

    assert jnp.allclose(y, ref, atol=1e-5, rtol=1e-5), "mismatch vs reference (bias)"
    assert jnp.allclose(y_nb, ref_nb, atol=1e-5, rtol=1e-5), "mismatch vs reference (no bias)"

    print("KERNEL_OK")
</pallas_src>

<mosaic_0001>
module attributes {stable_mosaic.version = 11 : i64} {
  func.func @_ln_kernel_bias(%arg0: i32, %arg1: memref<16x128xf32, #tpu.memory_space<vmem>>, %arg2: memref<1x128xf32, #tpu.memory_space<vmem>>, %arg3: memref<1x128xf32, #tpu.memory_space<vmem>>, %arg4: memref<16x128xf32, #tpu.memory_space<vmem>>) attributes {dimension_semantics = [#tpu.dimension_semantics<parallel>], iteration_bounds = array<i64: 1>, scalar_prefetch = 0 : i64, scratch_operands = 0 : i64, tpu.core_type = #tpu.core_type<tc>, window_params = [{transform_indices = @transform_0, window_bounds = array<i64: 16, 128>}, {pipeline_mode = #tpu.pipeline_mode<synchronous>, transform_indices = @transform_1, window_bounds = array<i64: 1, 128>}, {pipeline_mode = #tpu.pipeline_mode<synchronous>, transform_indices = @transform_2, window_bounds = array<i64: 1, 128>}, {transform_indices = @transform_3, window_bounds = array<i64: 16, 128>}]} {
    %c0 = arith.constant 0 : index
    %c0_0 = arith.constant 0 : index
    %0 = vector.load %arg1[%c0, %c0_0] : memref<16x128xf32, #tpu.memory_space<vmem>>, vector<16x128xf32>
    %cst = arith.constant dense<0.000000e+00> : vector<16xf32>
    %1 = vector.multi_reduction <add>, %0, %cst [1] : vector<16x128xf32> to vector<16xf32>
    %2 = vector.shape_cast %1 : vector<16xf32> to vector<16x1xf32>
    %3 = arith.mulf %0, %0 : vector<16x128xf32>
    %cst_1 = arith.constant dense<0.000000e+00> : vector<16xf32>
    %4 = vector.multi_reduction <add>, %3, %cst_1 [1] : vector<16x128xf32> to vector<16xf32>
    %5 = vector.shape_cast %4 : vector<16xf32> to vector<16x1xf32>
    %cst_2 = arith.constant 3.125000e-02 : f32
    %6 = vector.broadcast %cst_2 : f32 to vector<16x1xf32>
    %7 = arith.mulf %2, %6 : vector<16x1xf32>
    %cst_3 = arith.constant 3.125000e-02 : f32
    %8 = vector.broadcast %cst_3 : f32 to vector<16x1xf32>
    %9 = arith.mulf %5, %8 : vector<16x1xf32>
    %10 = arith.mulf %7, %7 : vector<16x1xf32>
    %11 = arith.subf %9, %10 : vector<16x1xf32>
    %cst_4 = arith.constant 0.000000e+00 : f32
    %12 = vector.broadcast %cst_4 : f32 to vector<16x1xf32>
    %13 = arith.maximumf %11, %12 : vector<16x1xf32>
    %cst_5 = arith.constant 9.99999974E-6 : f32
    %14 = vector.broadcast %cst_5 : f32 to vector<16x1xf32>
    %15 = arith.addf %13, %14 : vector<16x1xf32>
    %16 = math.rsqrt %15 : vector<16x1xf32>
    %17 = vector.broadcast %7 : vector<16x1xf32> to vector<16x128xf32>
    %18 = arith.subf %0, %17 : vector<16x128xf32>
    %19 = vector.broadcast %16 : vector<16x1xf32> to vector<16x128xf32>
    %20 = arith.mulf %18, %19 : vector<16x128xf32>
    %c0_6 = arith.constant 0 : index
    %c0_7 = arith.constant 0 : index
    %21 = vector.load %arg2[%c0_6, %c0_7] : memref<1x128xf32, #tpu.memory_space<vmem>>, vector<1x128xf32>
    %22 = vector.broadcast %21 : vector<1x128xf32> to vector<16x128xf32>
    %23 = arith.mulf %20, %22 : vector<16x128xf32>
    %c0_8 = arith.constant 0 : index
    %c0_9 = arith.constant 0 : index
    %24 = vector.load %arg3[%c0_8, %c0_9] : memref<1x128xf32, #tpu.memory_space<vmem>>, vector<1x128xf32>
    %25 = vector.broadcast %24 : vector<1x128xf32> to vector<16x128xf32>
    %26 = arith.addf %23, %25 : vector<16x128xf32>
    %c0_10 = arith.constant 0 : index
    %c0_11 = arith.constant 0 : index
    %27 = vector.load %arg4[%c0_10, %c0_11] : memref<16x128xf32, #tpu.memory_space<vmem>>, vector<16x128xf32>
    tpu.vector_store %arg4[%c0_10, %c0_11], %26 {strides = array<i32>} : memref<16x128xf32, #tpu.memory_space<vmem>>, vector<16x128xf32>,
    return
  }
  func.func @transform_0(%arg0: i32) -> (i32, i32) {
    %c0_i32 = arith.constant 0 : i32
    %c0_i32_0 = arith.constant 0 : i32
    return %arg0, %c0_i32 : i32, i32
  }
  func.func @transform_1(%arg0: i32) -> (i32, i32) {
    %c0_i32 = arith.constant 0 : i32
    %c0_i32_0 = arith.constant 0 : i32
    %c0_i32_1 = arith.constant 0 : i32
    return %c0_i32, %c0_i32_0 : i32, i32
  }
  func.func @transform_2(%arg0: i32) -> (i32, i32) {
    %c0_i32 = arith.constant 0 : i32
    %c0_i32_0 = arith.constant 0 : i32
    %c0_i32_1 = arith.constant 0 : i32
    return %c0_i32, %c0_i32_0 : i32, i32
  }
  func.func @transform_3(%arg0: i32) -> (i32, i32) {
    %c0_i32 = arith.constant 0 : i32
    %c0_i32_0 = arith.constant 0 : i32
    return %arg0, %c0_i32 : i32, i32
  }
}

</mosaic_0001>

<bundles_post_ra>
// kernel: tpu_custom_call.1
= control target key start
LH: loop header
LB: loop body
LE: loop exit
PB: predicated region body
PF: predicated region fallthrough
CT: control target
= control target key end

     0   :  { %8 = vsyncpa [#allocation3], 0  ;;  %s214_s0 = inlined_call_operand.hbm [shape: f32[16,128], index: 0, kind: input, shape index: {}]   ;;  %s215_s1 = inlined_call_operand.vmem [shape: f32[1,128], index: 1, kind: input, shape index: {}]   ;;  %s216_s2 = inlined_call_operand.vmem [shape: f32[1,128], index: 2, kind: input, shape index: {}]   ;;  %s217_s3 = inlined_call_operand.hbm [shape: f32[16,128], index: 3, kind: output, shape index: {}]  }
   0x1   :  { %9 = vsyncpa [#allocation4], 0  ;;  %s154_s12 = smov [#allocation2]   ;;  %s106_s16 = scalar_lea.hbm %s214_s0, 256 }
   0x2   :  { %s15_s13 = sshll.u32 %s154_s12, 4  ;;  %p107_p0 = scmp.ne.s32.totalorder %s214_s0, %s106_s16  ;;  %s16_s13 = int_to_ptr.vmem [resolvable:$true] %s15_s13 }
   0x3   :  { %p110_p1 = scmp.lt.u32.totalorder %s106_s16, %s214_s0 }
   0x5   :  { %p112_p2 = pnand %p110_p1, %p107_p0 }
   0x7   :  { %115 = shalt.err (!%p112_p2)
}
   0x8   :  { %s116_s21 = scalar_lea.vmem %s16_s13, 256  ;;  %p121_p4 = scmp.lt.s32.totalorder %s16_s13, %s16_s13 }
   0x9   :  { %p117_p3 = scmp.ne.s32.totalorder %s16_s13, %s116_s21  ;;  %p122_p5 = scmp.lt.s32.totalorder %s116_s21, %s116_s21 }
   0xb   :  { %p123_p6 = por %p122_p5, %p121_p4 }
   0xd   :  { %p124_p7 = pnand %p123_p6, %p117_p3 }
   0xf   :  { %127 = shalt.err (!%p124_p7)
}
  0x10   :  { %s155_s22 = smov 128   ;;  %s156_s23 = smov 8  }
  0x11   :  { %21 = dma.hbm_to_vmem [thread:$0]  %s214_s0, 256, %s16_s13, [#allocation3], %s155_s22, %s155_s22, %s156_s23  }
  0x12   :  { %150 = dma.done.wait [#allocation3], 256  }
  0x13   :  { %151 = vsyncadd [#allocation3], 4294967040  ;;  %v29_v0 = vld [vmem:[#allocation2] sm:$0xff]  ;;  %v30_v1 = vld [vmem:[#allocation2 + $0x8] sm:$0xff]  ;;  %s157_s29 = smov [#allocation5]  }
  0x14   :  { %31 = vadd.xlane.f32.xlu0 %v29_v0  ;;  %v35_v2 = vmul.f32 %v29_v0, %v29_v0  ;;  %v36_v3 = vmul.f32 %v30_v1, %v30_v1  ;;  %v96_v22 = vld [vmem:[%s215_s1] ss:$0 sm:$0xff]  ;;  %s84_s30 = sshll.u32 %s157_s29, 4  ;;  %s85_s30 = int_to_ptr.vmem [resolvable:$true] %s84_s30 }
  0x15   :  { %v97_v24 = vld [vmem:[%s216_s2] ss:$0 sm:$0xff]  ;;  %s128_s4 = scalar_lea.vmem %s85_s30, 256  ;;  %p133_p9 = scmp.lt.s32.totalorder %s85_s30, %s85_s30 }
  0x16   :  { %37 = vadd.xlane.f32.xlu1 %v35_v2  ;;  %p129_p8 = scmp.ne.s32.totalorder %s85_s30, %s128_s4  ;;  %p134_p10 = scmp.lt.s32.totalorder %s128_s4, %s128_s4 }
  0x18   :  { %33 = vadd.xlane.f32.xlu0 %v30_v1  ;;  %p135_p11 = por %p134_p10, %p133_p9 }
  0x1a   :  { %39 = vadd.xlane.f32.xlu1 %v36_v3  ;;  %p136_p12 = pnand %p135_p11, %p129_p8 }
  0xa1   :  { %v32_v4 = vpop.xlane.xlu0 %31 }
  0xa2   :  { %v41_v5 = vmul.f32 0.03125, %v32_v4 }
  0xa3   :  { %v38_v6 = vpop.xlane.xlu1 %37 }
  0xa4   :  { %v45_v7 = vmul.f32 %v41_v5, %v41_v5  ;;  %v43_v8 = vmul.f32 0.03125, %v38_v6  ;;  %v55_v20 = vsub.f32 %v29_v0, %v41_v5 }
  0xa5   :  { %v34_v9 = vpop.xlane.xlu0 %33 }
  0xa6   :  { %v47_v10 = vsub.f32 %v43_v8, %v45_v7  ;;  %v42_v11 = vmul.f32 0.03125, %v34_v9 }
  0xa7   :  { %v40_v12 = vpop.xlane.xlu1 %39 }
  0xa8   :  { %v49_v13 = vmax.f32 %v47_v10, 0.0  ;;  %v46_v14 = vmul.f32 %v42_v11, %v42_v11  ;;  %v44_v15 = vmul.f32 0.03125, %v40_v12  ;;  %v56_v25 = vsub.f32 %v30_v1, %v42_v11 }
  0xaa   :  { %v51_v16 = vadd.f32 1e-05, %v49_v13  ;;  %v48_v17 = vsub.f32 %v44_v15, %v46_v14 }
  0xac   :  { %102 = vrsqrt.f32 %v51_v16  ;;  %v50_v18 = vmax.f32 %v48_v17, 0.0 }
  0xae   :  { %v52_v19 = vadd.f32 1e-05, %v50_v18 }
  0xb0   :  { %104 = vrsqrt.f32 %v52_v19 }
  0xb6   :  { %v103_v21 = vpop.eup %102 }
  0xb7   :  { %v57_v23 = vmul.f32 %v103_v21, %v55_v20 }
  0xb9   :  { %v66_v26 = vmul.f32 %v96_v22, %v57_v23 }
  0xba   :  { %v105_v27 = vpop.eup %104 }
  0xbb   :  { %v58_v28 = vmul.f32 %v105_v27, %v56_v25  ;;  %v75_v29 = vadd.f32 %v97_v24, %v66_v26 }
  0xbd   :  { %v67_v30 = vmul.f32 %v96_v22, %v58_v28  ;;  %77 = vst [vmem:[#allocation5] sm:$0xff] %v75_v29 }
  0xbf   :  { %v76_v31 = vadd.f32 %v97_v24, %v67_v30 }
  0xc1   :  { %78 = vst [vmem:[#allocation5 + $0x8] sm:$0xff] %v76_v31 }
  0xc2   :  { %139 = shalt.err (!%p136_p12)
}
  0xc3   :  { %s140_s5 = scalar_lea.hbm %s217_s3, 256 }
  0xc4   :  { %p141_p13 = scmp.ne.s32.totalorder %s217_s3, %s140_s5  ;;  %p144_p0 = scmp.lt.u32.totalorder %s140_s5, %s217_s3 }
  0xc6   :  { %p146_p1 = pnand %p144_p0, %p141_p13 }
  0xc8   :  { %149 = shalt.err (!%p146_p1)
}
  0xc9   :  { %90 = dma.vmem_to_hbm [thread:$0]  %s85_s30, 256, %s217_s3, [#allocation4], %s155_s22, %s155_s22, %s156_s23  }
  0xca   :  { %152 = dma.done.wait [#allocation4], 256  }
  0xcb   :  { %153 = vsyncadd [#allocation4], 4294967040 }
  0xcc   :  { %94 = vsyncpa [#allocation3], 1 }
  0xcd   :  { %95 = vsyncpa [#allocation4], 1 }

</bundles_post_ra>
